<compile_context>
chip_gen: v6e
topology: v6e:2x2x1
jax: 0.10.0
libtpu: 0.0.40
codegen_flags: <defaults>
</compile_context>

<pallas_src>
import functools

import jax
import jax.numpy as jnp
from jax import lax
from jax.experimental import pallas as pl
from jax.experimental.pallas import tpu as pltpu

_GN_EPS = 1e-5  # torch.nn.GroupNorm default eps


# ----------------------------------------------------------------------------
# Kernel
# ----------------------------------------------------------------------------
def _shuffle_attn_kernel(xa_ref, xb_ref, p_ref, o_ref):
    """One grid step: one batch tile x one tile of gt shuffled output columns.

    xa_ref: (btile, rows, hw)    source slabs for the even final channels
    xb_ref: (btile, rows, hw)    source slabs for the odd  final channels
    p_ref : (6, rows, 1)         fused per-row constants (branch baked in):
                                 [a_coef_a, mean_coef_a, const_a,
                                  a_coef_b, mean_coef_b, const_b]
    o_ref : (btile, rows, 2*hw)  lanes [0,hw)=even channel, [hw,2hw)=odd channel
    """
    hw = xa_ref.shape[-1]
    inv_hw = jnp.float32(1.0 / hw)
    eps = jnp.float32(_GN_EPS)
    p = p_ref[...]  # (6, rows, 1) float32

    def gated(x, a_coef, mean_coef, const):
        # x: (btile, rows, hw) f32.  Computes x * sigmoid(z) with
        #   channel rows: z = cweight*mean(x) + cbias           (a_coef == 0)
        #   spatial rows: z = -sweight*GroupNorm(x) + sbias     (mean_coef == 0)
        # via x*sigmoid(z) = 0.5*x*(tanh(z/2)+1); the 1/2 is folded into the
        # wrapper-precomputed per-row constants (one EUP push per element).
        s1 = jnp.sum(x, axis=-1, keepdims=True) * inv_hw          # mean
        xc = x - s1
        var = jnp.sum(xc * xc, axis=-1, keepdims=True) * inv_hw   # two-pass var
        a2 = a_coef * lax.rsqrt(var + eps)                        # (bt, rows, 1)
        d2 = mean_coef * s1 + const                               # (bt, rows, 1)
        zz = xc * a2 + d2
        return (0.5 * x) * (jnp.tanh(zz) + 1.0)

    xa = xa_ref[...].astype(jnp.float32)
    xb = xb_ref[...].astype(jnp.float32)
    oa = gated(xa, p[0], p[1], p[2])   # -> even final channels
    ob = gated(xb, p[3], p[4], p[5])   # -> odd  final channels

    # channel_shuffle(2) in NCHW memory == per-row lane concat [oa | ob].
    o_ref[...] = jnp.concatenate([oa, ob], axis=-1).astype(o_ref.dtype)


# ----------------------------------------------------------------------------
# Tiling / VMEM heuristics
# ----------------------------------------------------------------------------
def _divisors(n):
    return [d for d in range(1, n + 1) if n % d == 0]


def _vmem_capacity_bytes():
    try:
        return int(pltpu.get_tpu_info().vmem_capacity_bytes)
    except Exception:
        return 64 << 20  # conservative (v7x-class) fallback


def _choose_tiling(b, groups, c_per, hw, itemsize, budget_bytes):
    """Pick (btile, gt): batch rows and shuffled columns per grid step."""
    # Sublane packing target: 8 rows for f32, 16 for bf16, 32 for int8.
    sub_target = max(8, 32 // max(int(itemsize), 1))
    gt = groups
    for d in _divisors(groups):
        if d * c_per >= sub_target:
            gt = d
            break

    def est_bytes(bt, g):
        elems = bt * g * c_per * hw
        # double-buffered I/O (2 input slabs + 1 double-width output slab)
        # plus ~6 live f32 full-tile temporaries inside the kernel.
        return elems * (8 * itemsize + 24)

    btile = 1
    for d in _divisors(b):
        if est_bytes(d, gt) <= budget_bytes:
            btile = d

    # Prefer >= 2 grid steps so megacore / both v7x TensorCores get work.
    if btile == b and (groups // gt) == 1 and b > 1:
        smaller = [d for d in _divisors(b) if d < b]
        if smaller:
            btile = smaller[-1]
    return btile, gt


# ----------------------------------------------------------------------------
# Wrapper
# ----------------------------------------------------------------------------
@functools.partial(jax.jit, static_argnames=("groups",))
def shuffle_attention(x, params, *, groups):
    """x: (b, c, h, w) NCHW (matching the PyTorch module).
    params: (6, c_per) rows = [cweight, cbias, sweight, sbias, gn_w, gn_b],
    with c_per = c // (2 * groups).
    """
    b, c, h, w = x.shape
    assert c % (2 * groups) == 0, "channels must be divisible by 2*groups"
    c_per = c // (2 * groups)
    hw = h * w
    itemsize = jnp.dtype(x.dtype).itemsize

    # Generation-aware VMEM budget: 48 MiB limit on 64 MiB parts (v7x),
    # ~100 MiB on 128 MiB parts (v5e/v6e).
    cap = _vmem_capacity_bytes()
    vmem_limit = int(min(max(cap - (16 << 20), 32 << 20), 100 << 20))
    budget = (vmem_limit * 3) // 4

    btile, gt = _choose_tiling(b, groups, c_per, hw, itemsize, budget)
    n_ct = groups // gt          # number of shuffled column tiles
    rows = gt * c_per            # sublane rows per input slab

    # Contiguous (free) reshape only — no transpose at the JAX level.
    # Axis-1 index T covers gt consecutive pre-shuffle group slabs:
    #   slab a of tile j -> T = j,  slab b of tile j -> T = j + n_ct.
    xv = x.reshape(b, 2 * n_ct, rows, hw)

    # Fused per-row constants (branch baked in; halved for the tanh-sigmoid).
    cw, cb, sw, sb, gw, gb = [params[i].astype(jnp.float32) for i in range(6)]
    a_sp = -0.5 * sw * gw            # spatial slope (pre-rsqrt)
    d_sp = 0.5 * (sb - sw * gb)      # spatial constant
    c_ch = 0.5 * cw                  # channel mean coefficient
    d_ch = 0.5 * cb                  # channel constant

    t_a = jnp.arange(n_ct)[:, None] * gt + jnp.arange(gt)[None, :]  # (n_ct, gt)

    def planes(t):
        m = (t % 2 == 0).astype(jnp.float32)[:, :, None]            # channel mask
        p_a = (1.0 - m) * a_sp[None, None, :]
        p_c = m * c_ch[None, None, :]
        p_d = m * d_ch[None, None, :] + (1.0 - m) * d_sp[None, None, :]
        return jnp.stack([p_a, p_c, p_d], axis=1)                   # (n_ct,3,gt,c_per)

    pcoef = jnp.concatenate([planes(t_a), planes(t_a + groups)], axis=1)
    pcoef = pcoef.reshape(n_ct, 6, rows, 1)

    grid = (b // btile, n_ct)

    out = pl.pallas_call(
        _shuffle_attn_kernel,
        out_shape=jax.ShapeDtypeStruct((b, n_ct, rows, 2 * hw), x.dtype),
        grid_spec=pltpu.PrefetchScalarGridSpec(
            num_scalar_prefetch=0,
            grid=grid,
            in_specs=[
                # slab a: input columns t = j*gt .. j*gt+gt-1
                pl.BlockSpec((btile, None, rows, hw),
                             lambda i, j: (i, j, 0, 0)),
                # slab b: input columns t = j*gt+groups .. (offset by n_ct)
                pl.BlockSpec((btile, None, rows, hw),
                             lambda i, j: (i, j + n_ct, 0, 0)),
                # per-column-tile fused constants (tiny)
                pl.BlockSpec((None, 6, rows, 1),
                             lambda i, j: (j, 0, 0, 0)),
            ],
            out_specs=pl.BlockSpec((btile, None, rows, 2 * hw),
                                   lambda i, j: (i, j, 0, 0)),
        ),
        compiler_params=pltpu.CompilerParams(
            dimension_semantics=("parallel", "parallel"),
            vmem_limit_bytes=vmem_limit,
        ),
    )(xv, xv, pcoef)

    # (b, n_ct, rows, 2*hw) is exactly the shuffled NCHW layout: free reshape.
    return out.reshape(b, c, h, w)


# ----------------------------------------------------------------------------
# Pure-JAX reference (intended semantics of the PyTorch forward)
# ----------------------------------------------------------------------------
def _reference(x, params, groups):
    b, c, h, w = x.shape
    c_per = c // (2 * groups)
    cw, cb, sw, sb, g, bta = [p.reshape(1, c_per, 1, 1) for p in params]
    xg = x.reshape(b * groups, c // groups, h, w)
    x0, x1 = xg[:, :c_per], xg[:, c_per:]

    xn = jnp.mean(x0, axis=(2, 3), keepdims=True)
    xn = cw * xn + cb
    xn = x0 * jax.nn.sigmoid(xn)

    mean = jnp.mean(x1, axis=(2, 3), keepdims=True)
    var = jnp.mean((x1 - mean) ** 2, axis=(2, 3), keepdims=True)
    gn = (x1 - mean) / jnp.sqrt(var + _GN_EPS) * g + bta
    xs = -sw * gn + sb
    xs = x1 * jax.nn.sigmoid(xs)

    out = jnp.concatenate([xn, xs], axis=1).reshape(b, c, h, w)
    out = out.reshape(b, 2, c // 2, h, w).transpose(0, 2, 1, 3, 4)
    return out.reshape(b, c, h, w)


if __name__ == "__main__":
    def run_case(b, c, h, w, groups, key):
        c_per = c // (2 * groups)
        kx, kp, kg = jax.random.split(key, 3)
        x = jax.random.normal(kx, (b, c, h, w), dtype=jnp.float32)
        # Module inits c/s weights+biases to zeros (trivial 0.5 gates); use
        # nonzero values to exercise the full math path (same shapes).
        wb = 0.5 * jax.random.normal(kp, (4, c_per), dtype=jnp.float32)
        gn_gamma = 1.0 + 0.1 * jax.random.normal(kg, (1, c_per), dtype=jnp.float32)
        gn_beta = jnp.zeros((1, c_per), jnp.float32)
        params = jnp.concatenate([wb, gn_gamma, gn_beta], axis=0)  # (6, c_per)

        out = jax.block_until_ready(shuffle_attention(x, params, groups=groups))
        ref = _reference(x, params, groups)
        assert out.shape == (b, c, h, w)
        err = float(jnp.max(jnp.abs(out - ref)))
        assert err < 3e-5, (b, c, h, w, groups, err)

    key = jax.random.PRNGKey(0)
    k1, k2, k3 = jax.random.split(key, 3)
    run_case(2, 8, 16, 16, 2, k1)    # even groups: packed columns (gt = 2)
    run_case(2, 12, 16, 16, 3, k2)   # odd groups: mixed-parity column tile
    run_case(2, 64, 16, 16, 4, k3)   # c_per = 8: gt = 1, multi-column grid
    print("KERNEL_OK")
</pallas_src>

<mosaic_0001>
module attributes {stable_mosaic.version = 11 : i64} {
  func.func @_shuffle_attn_kernel(%arg0: i32, %arg1: i32, %arg2: memref<1x1x4x256xf32, #tpu.memory_space<vmem>>, %arg3: memref<1x1x4x256xf32, #tpu.memory_space<vmem>>, %arg4: memref<1x6x4x1xf32, #tpu.memory_space<vmem>>, %arg5: memref<1x1x4x512xf32, #tpu.memory_space<vmem>>) attributes {dimension_semantics = [#tpu.dimension_semantics<parallel>, #tpu.dimension_semantics<parallel>], iteration_bounds = array<i64: 2, 1>, scalar_prefetch = 0 : i64, scratch_operands = 0 : i64, tpu.core_type = #tpu.core_type<tc>, window_params = [{transform_indices = @transform_0, window_bounds = array<i64: 1, 1, 4, 256>}, {transform_indices = @transform_1, window_bounds = array<i64: 1, 1, 4, 256>}, {transform_indices = @transform_2, window_bounds = array<i64: 1, 6, 4, 1>}, {transform_indices = @transform_3, window_bounds = array<i64: 1, 1, 4, 512>}]} {
    %c0 = arith.constant 0 : index
    %c0_0 = arith.constant 0 : index
    %c0_1 = arith.constant 0 : index
    %c0_2 = arith.constant 0 : index
    %0 = vector.load %arg4[%c0, %c0_0, %c0_1, %c0_2] : memref<1x6x4x1xf32, #tpu.memory_space<vmem>>, vector<1x6x4x1xf32>
    %1 = vector.shape_cast %0 : vector<1x6x4x1xf32> to vector<6x4x1xf32>
    %c0_3 = arith.constant 0 : index
    %c0_4 = arith.constant 0 : index
    %c0_5 = arith.constant 0 : index
    %c0_6 = arith.constant 0 : index
    %2 = vector.load %arg2[%c0_3, %c0_4, %c0_5, %c0_6] : memref<1x1x4x256xf32, #tpu.memory_space<vmem>>, vector<1x1x4x256xf32>
    %3 = vector.shape_cast %2 : vector<1x1x4x256xf32> to vector<1x4x256xf32>
    %c0_7 = arith.constant 0 : index
    %c0_8 = arith.constant 0 : index
    %c0_9 = arith.constant 0 : index
    %c0_10 = arith.constant 0 : index
    %4 = vector.load %arg3[%c0_7, %c0_8, %c0_9, %c0_10] : memref<1x1x4x256xf32, #tpu.memory_space<vmem>>, vector<1x1x4x256xf32>
    %5 = vector.shape_cast %4 : vector<1x1x4x256xf32> to vector<1x4x256xf32>
    %6 = vector.extract_strided_slice %1 {offsets = [0, 0, 0], sizes = [1, 4, 1], strides = [1, 1, 1]} : vector<6x4x1xf32> to vector<1x4x1xf32>
    %7 = vector.shape_cast %6 : vector<1x4x1xf32> to vector<4x1xf32>
    %8 = vector.extract_strided_slice %1 {offsets = [1, 0, 0], sizes = [1, 4, 1], strides = [1, 1, 1]} : vector<6x4x1xf32> to vector<1x4x1xf32>
    %9 = vector.shape_cast %8 : vector<1x4x1xf32> to vector<4x1xf32>
    %10 = vector.extract_strided_slice %1 {offsets = [2, 0, 0], sizes = [1, 4, 1], strides = [1, 1, 1]} : vector<6x4x1xf32> to vector<1x4x1xf32>
    %11 = vector.shape_cast %10 : vector<1x4x1xf32> to vector<4x1xf32>
    %cst = arith.constant dense<0.000000e+00> : vector<1x4xf32>
    %12 = vector.multi_reduction <add>, %3, %cst [2] : vector<1x4x256xf32> to vector<1x4xf32>
    %13 = vector.shape_cast %12 : vector<1x4xf32> to vector<1x4x1xf32>
    %cst_11 = arith.constant 3.906250e-03 : f32
    %14 = vector.broadcast %cst_11 : f32 to vector<1x4x1xf32>
    %15 = arith.mulf %13, %14 : vector<1x4x1xf32>
    %16 = vector.broadcast %15 : vector<1x4x1xf32> to vector<1x4x256xf32>
    %17 = arith.subf %3, %16 : vector<1x4x256xf32>
    %18 = arith.mulf %17, %17 : vector<1x4x256xf32>
    %cst_12 = arith.constant dense<0.000000e+00> : vector<1x4xf32>
    %19 = vector.multi_reduction <add>, %18, %cst_12 [2] : vector<1x4x256xf32> to vector<1x4xf32>
    %20 = vector.shape_cast %19 : vector<1x4xf32> to vector<1x4x1xf32>
    %cst_13 = arith.constant 3.906250e-03 : f32
    %21 = vector.broadcast %cst_13 : f32 to vector<1x4x1xf32>
    %22 = arith.mulf %20, %21 : vector<1x4x1xf32>
    %cst_14 = arith.constant 9.99999974E-6 : f32
    %23 = vector.broadcast %cst_14 : f32 to vector<1x4x1xf32>
    %24 = arith.addf %22, %23 : vector<1x4x1xf32>
    %25 = math.rsqrt %24 : vector<1x4x1xf32>
    %26 = vector.shape_cast %7 : vector<4x1xf32> to vector<1x4x1xf32>
    %27 = arith.mulf %26, %25 : vector<1x4x1xf32>
    %28 = vector.shape_cast %9 : vector<4x1xf32> to vector<1x4x1xf32>
    %29 = arith.mulf %28, %15 : vector<1x4x1xf32>
    %30 = vector.shape_cast %11 : vector<4x1xf32> to vector<1x4x1xf32>
    %31 = arith.addf %29, %30 : vector<1x4x1xf32>
    %32 = vector.broadcast %27 : vector<1x4x1xf32> to vector<1x4x256xf32>
    %33 = arith.mulf %17, %32 : vector<1x4x256xf32>
    %34 = vector.broadcast %31 : vector<1x4x1xf32> to vector<1x4x256xf32>
    %35 = arith.addf %33, %34 : vector<1x4x256xf32>
    %cst_15 = arith.constant 5.000000e-01 : f32
    %36 = vector.broadcast %cst_15 : f32 to vector<1x4x256xf32>
    %37 = arith.mulf %36, %3 : vector<1x4x256xf32>
    %38 = math.tanh %35 : vector<1x4x256xf32>
    %cst_16 = arith.constant 1.000000e+00 : f32
    %39 = vector.broadcast %cst_16 : f32 to vector<1x4x256xf32>
    %40 = arith.addf %38, %39 : vector<1x4x256xf32>
    %41 = arith.mulf %37, %40 : vector<1x4x256xf32>
    %42 = vector.extract_strided_slice %1 {offsets = [3, 0, 0], sizes = [1, 4, 1], strides = [1, 1, 1]} : vector<6x4x1xf32> to vector<1x4x1xf32>
    %43 = vector.shape_cast %42 : vector<1x4x1xf32> to vector<4x1xf32>
    %44 = vector.extract_strided_slice %1 {offsets = [4, 0, 0], sizes = [1, 4, 1], strides = [1, 1, 1]} : vector<6x4x1xf32> to vector<1x4x1xf32>
    %45 = vector.shape_cast %44 : vector<1x4x1xf32> to vector<4x1xf32>
    %46 = vector.extract_strided_slice %1 {offsets = [5, 0, 0], sizes = [1, 4, 1], strides = [1, 1, 1]} : vector<6x4x1xf32> to vector<1x4x1xf32>
    %47 = vector.shape_cast %46 : vector<1x4x1xf32> to vector<4x1xf32>
    %cst_17 = arith.constant dense<0.000000e+00> : vector<1x4xf32>
    %48 = vector.multi_reduction <add>, %5, %cst_17 [2] : vector<1x4x256xf32> to vector<1x4xf32>
    %49 = vector.shape_cast %48 : vector<1x4xf32> to vector<1x4x1xf32>
    %cst_18 = arith.constant 3.906250e-03 : f32
    %50 = vector.broadcast %cst_18 : f32 to vector<1x4x1xf32>
    %51 = arith.mulf %49, %50 : vector<1x4x1xf32>
    %52 = vector.broadcast %51 : vector<1x4x1xf32> to vector<1x4x256xf32>
    %53 = arith.subf %5, %52 : vector<1x4x256xf32>
    %54 = arith.mulf %53, %53 : vector<1x4x256xf32>
    %cst_19 = arith.constant dense<0.000000e+00> : vector<1x4xf32>
    %55 = vector.multi_reduction <add>, %54, %cst_19 [2] : vector<1x4x256xf32> to vector<1x4xf32>
    %56 = vector.shape_cast %55 : vector<1x4xf32> to vector<1x4x1xf32>
    %cst_20 = arith.constant 3.906250e-03 : f32
    %57 = vector.broadcast %cst_20 : f32 to vector<1x4x1xf32>
    %58 = arith.mulf %56, %57 : vector<1x4x1xf32>
    %cst_21 = arith.constant 9.99999974E-6 : f32
    %59 = vector.broadcast %cst_21 : f32 to vector<1x4x1xf32>
    %60 = arith.addf %58, %59 : vector<1x4x1xf32>
    %61 = math.rsqrt %60 : vector<1x4x1xf32>
    %62 = vector.shape_cast %43 : vector<4x1xf32> to vector<1x4x1xf32>
    %63 = arith.mulf %62, %61 : vector<1x4x1xf32>
    %64 = vector.shape_cast %45 : vector<4x1xf32> to vector<1x4x1xf32>
    %65 = arith.mulf %64, %51 : vector<1x4x1xf32>
    %66 = vector.shape_cast %47 : vector<4x1xf32> to vector<1x4x1xf32>
    %67 = arith.addf %65, %66 : vector<1x4x1xf32>
    %68 = vector.broadcast %63 : vector<1x4x1xf32> to vector<1x4x256xf32>
    %69 = arith.mulf %53, %68 : vector<1x4x256xf32>
    %70 = vector.broadcast %67 : vector<1x4x1xf32> to vector<1x4x256xf32>
    %71 = arith.addf %69, %70 : vector<1x4x256xf32>
    %cst_22 = arith.constant 5.000000e-01 : f32
    %72 = vector.broadcast %cst_22 : f32 to vector<1x4x256xf32>
    %73 = arith.mulf %72, %5 : vector<1x4x256xf32>
    %74 = math.tanh %71 : vector<1x4x256xf32>
    %cst_23 = arith.constant 1.000000e+00 : f32
    %75 = vector.broadcast %cst_23 : f32 to vector<1x4x256xf32>
    %76 = arith.addf %74, %75 : vector<1x4x256xf32>
    %77 = arith.mulf %73, %76 : vector<1x4x256xf32>
    %78 = tpu.concatenate %41, %77 in 2 : vector<1x4x256xf32>, vector<1x4x256xf32> -> vector<1x4x512xf32>
    %c0_24 = arith.constant 0 : index
    %c0_25 = arith.constant 0 : index
    %c0_26 = arith.constant 0 : index
    %c0_27 = arith.constant 0 : index
    %79 = vector.load %arg5[%c0_24, %c0_25, %c0_26, %c0_27] : memref<1x1x4x512xf32, #tpu.memory_space<vmem>>, vector<1x1x4x512xf32>
    %80 = vector.shape_cast %79 : vector<1x1x4x512xf32> to vector<1x4x512xf32>
    %81 = vector.shape_cast %78 : vector<1x4x512xf32> to vector<1x1x4x512xf32>
    tpu.vector_store %arg5[%c0_24, %c0_25, %c0_26, %c0_27], %81 {strides = array<i32>} : memref<1x1x4x512xf32, #tpu.memory_space<vmem>>, vector<1x1x4x512xf32>,
    return
  }
  func.func @transform_0(%arg0: i32, %arg1: i32) -> (i32, i32, i32, i32) {
    %c0_i32 = arith.constant 0 : i32
    %c0_i32_0 = arith.constant 0 : i32
    %c0_i32_1 = arith.constant 0 : i32
    return %arg0, %arg1, %c0_i32, %c0_i32_0 : i32, i32, i32, i32
  }
  func.func @transform_1(%arg0: i32, %arg1: i32) -> (i32, i32, i32, i32) {
    %c1_i32 = arith.constant 1 : i32
    %0 = arith.addi %arg1, %c1_i32 : i32
    %c0_i32 = arith.constant 0 : i32
    %c0_i32_0 = arith.constant 0 : i32
    %c0_i32_1 = arith.constant 0 : i32
    return %arg0, %0, %c0_i32, %c0_i32_0 : i32, i32, i32, i32
  }
  func.func @transform_2(%arg0: i32, %arg1: i32) -> (i32, i32, i32, i32) {
    %c0_i32 = arith.constant 0 : i32
    %c0_i32_0 = arith.constant 0 : i32
    %c0_i32_1 = arith.constant 0 : i32
    %c0_i32_2 = arith.constant 0 : i32
    return %arg1, %c0_i32, %c0_i32_0, %c0_i32_1 : i32, i32, i32, i32
  }
  func.func @transform_3(%arg0: i32, %arg1: i32) -> (i32, i32, i32, i32) {
    %c0_i32 = arith.constant 0 : i32
    %c0_i32_0 = arith.constant 0 : i32
    %c0_i32_1 = arith.constant 0 : i32
    return %arg0, %arg1, %c0_i32, %c0_i32_0 : i32, i32, i32, i32
  }
}

</mosaic_0001>

<bundles_post_ra>
// kernel: shuffle_attention.1
= control target key start
LH: loop header
LB: loop body
LE: loop exit
PB: predicated region body
PF: predicated region fallthrough
CT: control target
= control target key end

     0   :  { %s647_s12 = smov 0   ;;  %s649_s13 = smov 0   ;;  %s728_s0 = inlined_call_operand.vmem [shape: f32[2,2,4,256], index: 0, kind: input, shape index: {}, may-alias: {0,1}]   ;;  %s729_s1 = inlined_call_operand.vmem [shape: f32[2,2,4,256], index: 1, kind: input, shape index: {}, may-alias: {0,1}]   ;;  %s730_s2 = inlined_call_operand.vmem [shape: f32[1,6,4,1], index: 2, kind: input, shape index: {}]   ;;  %s731_s3 = inlined_call_operand.vmem [shape: f32[2,1,4,512], index: 3, kind: output, shape index: {}]  }
   0x1   :  { %s651_s14 = smov 0  }
   0x2 LB: > { %s25_s15 = sadd.s32 1, %s619_s13  ;;  %p549_p0 = scmp.ge.s32.totalorder %s623_s14, 1  ;;  %s623_s14 = sphi %s651_s14, %s13_s14   ;;  %s619_s13 = sphi %s649_s13, %s733_s13   ;;  %s615_s12 = sphi %s647_s12, %s732_s12  }
   0x3   : > { %p27_p1 = scmp.ge.s32.totalorder %s25_s15, 2  ;;  %p187_p2 = scmp.lt.s32.totalorder %s623_s14, 3 }
   0x5   : > { %s735_s15 = smov (%p27_p1, %s25_s15), 0  ;;  %p188_p3 = pnand %p549_p0, %p187_p2 }
   0x6   : > { %p234_p4 = scmp.lt.s32.totalorder (!%p188_p3), %s615_s12, 1 }
   0x7   : > { %191 = sbr.rel (%p188_p3) target bundleno = 489 (0x1e9), region = 32 }
   0xc   : > { %s737_s12 = smov (!%p234_p4, %s615_s12), 1  ;;  %vm279_vm0 = vcmask 1043456   ;;  %v625_v10 = vmov 0   ;;  %v626_v11 = vmov 839922192   ;;  %v290_v13 = vlaneseq }
   0xd   : > { %s665_s16 = sshll.u32 %s737_s12, 4  ;;  %590 = vset.pattern.permute.xlu1 %v625_v10  ;;  %589 = vset.pattern.permute.xlu0 %v625_v10  ;;  %v288_v12 = vunpack.c.l.s4 %v626_v11  ;;  %v269_v35 = vld [vmem:[%s730_s2 + $0x4] sm:$0xf]  ;;  %v270_v37 = vld [vmem:[%s730_s2 + $0x8] sm:$0xf] }
   0xe   : > { %s242_s19 = scalar_lea.vmem %s728_s0, %s665_s16  ;;  %s560_s20 = sadd.s32 8, %s665_s16  ;;  %v291_v15 = vshrl.u32 %v290_v13, 7  ;;  %v268_v45 = vld [vmem:[%s730_s2] sm:$0xf]  ;;  %v272_v48 = vld [vmem:[%s730_s2 + $0x10] sm:$0xf] }
   0xf   : > { %v671_v0 = vld [vmem:[%s242_s19] sm:$0xff]  ;;  %s252_s23 = scalar_lea.vmem %s729_s1, %s560_s20  ;;  %v289_v14 = vunpack.c.0.s8 %v288_v12  ;;  %v271_v49 = vld [vmem:[%s730_s2 + $0xc] sm:$0xf]  ;;  %v273_v53 = vld [vmem:[%s730_s2 + $0x14] sm:$0xf]  ;;  %s267_s11 = scalar_lea.vmem %s731_s3, %s665_s16 }
  0x10   : > { %v277_v1 = vcombine.high %v671_v0, %v671_v0  ;;  %v280_v2 = vsel %vm279_vm0, %v671_v0, 0.0  ;;  %v681_v3 = vld [vmem:[%s252_s23] sm:$0xff] }
  0x11   : > { %v342_v5 = vcombine.high %v681_v3, %v681_v3  ;;  %v344_v6 = vsel %vm279_vm0, %v681_v3, 0.0  ;;  %v292_v16 = vsub.s32 %v289_v14, %v291_v15  ;;  %v401_v10 = vmul.f32 0.5, %v681_v3 }
  0x12   : > { %v281_v4 = vsel %vm279_vm0, %v277_v1, 0.0 }
  0x13   : > { %v282_v7 = vadd.f32 %v281_v4, %v280_v2  ;;  %v345_v8 = vsel %vm279_vm0, %v342_v5, 0.0  ;;  %v337_v5 = vmul.f32 0.5, %v671_v0 }
  0x14   : > { %v346_v9 = vadd.f32 %v345_v8, %v344_v6 }
  0x15   : > { %283 = vadd.xlane.f32.xlu0 %v282_v7 }
  0x19   : > { %347 = vadd.xlane.f32.xlu0 %v346_v9 }
  0x9e   : > { %v284_v17 = vpop.xlane.xlu0 %283 }
  0x9f   : > { %v285_v18 = vmul.f32 0.00390625, %v284_v17 }
  0xa1   : > { %v293_v19 = vrot.slane %v285_v18, %v292_v16  ;;  %v309_v36 = vmul.f32 %v285_v18, %v269_v35 }
  0xa2   : > { %v348_v20 = vpop.xlane.xlu0 %347 }
  0xa3   : > { %v295_v21 = vsub.f32 %v671_v0, %v293_v19  ;;  %v349_v22 = vmul.f32 0.00390625, %v348_v20  ;;  %v310_v38 = vadd.f32 %v309_v36, %v270_v37 }
  0xa5   : > { %v357_v23 = vrot.slane %v349_v22, %v292_v16  ;;  %v296_v24 = vmul.f32 %v295_v21, %v295_v21  ;;  %v373_v51 = vmul.f32 %v349_v22, %v272_v48 }
  0xa7   : > { %v359_v25 = vsub.f32 %v681_v3, %v357_v23  ;;  %v298_v26 = vcombine.high %v296_v24, %v296_v24  ;;  %v300_v27 = vsel %vm279_vm0, %v296_v24, 0.0  ;;  %v374_v54 = vadd.f32 %v373_v51, %v273_v53 }
  0xa9   : > { %v301_v28 = vsel %vm279_vm0, %v298_v26, 0.0  ;;  %v360_v29 = vmul.f32 %v359_v25, %v359_v25 }
  0xaa   : > { %v302_v30 = vadd.f32 %v301_v28, %v300_v27 }
  0xab   : > { %v362_v31 = vcombine.high %v360_v29, %v360_v29  ;;  %v364_v32 = vsel %vm279_vm0, %v360_v29, 0.0 }
  0xac   : > { %303 = vadd.xlane.f32.xlu1 %v302_v30 }
  0xad   : > { %v365_v33 = vsel %vm279_vm0, %v362_v31, 0.0 }
  0xae   : > { %v366_v34 = vadd.f32 %v365_v33, %v364_v32 }
  0xb0   : > { %367 = vadd.xlane.f32.xlu1 %v366_v34 }
  0xc1   : > { %326 = vperm.xlu1 %590, %v310_v38  }
 0x135   : > { %v304_v39 = vpop.xlane.xlu1 %303 }
 0x136   : > { %v305_v40 = vmul.f32 0.00390625, %v304_v39 }
 0x138   : > { %v306_v41 = vadd.f32 1e-05, %v305_v40 }
 0x139   : > { %v368_v42 = vpop.xlane.xlu1 %367 }
 0x13a   : > { %593 = vrsqrt.f32 %v306_v41  ;;  %v369_v43 = vmul.f32 0.00390625, %v368_v42 }
 0x13c   : > { %v370_v44 = vadd.f32 1e-05, %v369_v43 }
 0x13d   : > { %v327_v55 = vpop.permute.xlu1 %326 }
 0x13e   : > { %595 = vrsqrt.f32 %v370_v44  ;;  %v334_v58 = vrot.slane %v327_v55, %v292_v16 }
 0x147   : > { %v594_v46 = vpop.eup %593 }
 0x148   : > { %v308_v47 = vmul.f32 %v594_v46, %v268_v45 }
 0x14a   : > { %313 = vperm.xlu0 %589, %v308_v47  }
 0x14b   : > { %v596_v50 = vpop.eup %595 }
 0x14c   : > { %v372_v52 = vmul.f32 %v596_v50, %v271_v49 }
 0x14e   : > { %377 = vperm.xlu1 %590, %v372_v52  }
 0x152   : > { %390 = vperm.xlu1 %590, %v374_v54  }
 0x1c5   : > { %v314_v56 = vpop.permute.xlu0 %313 }
 0x1c6   : > { %v321_v57 = vrot.slane %v314_v56, %v292_v16 }
 0x1c8   : > { %v323_v59 = vmul.f32 %v321_v57, %v295_v21 }
 0x1c9   : > { %v378_v60 = vpop.permute.xlu1 %377 }
 0x1ca   : > { %v336_v61 = vadd.f32 %v334_v58, %v323_v59  ;;  %v385_v62 = vrot.slane %v378_v60, %v292_v16 }
 0x1cc   : > { %597 = vtanh.f32 %v336_v61  ;;  %v387_v1 = vmul.f32 %v385_v62, %v359_v25 }
 0x1cd   : > { %v391_v63 = vpop.permute.xlu1 %390 }
 0x1ce   : > { %v398_v2 = vrot.slane %v391_v63, %v292_v16 }
 0x1d0   : > { %v400_v4 = vadd.f32 %v398_v2, %v387_v1 }
 0x1d2   : > { %599 = vtanh.f32 %v400_v4 }
 0x1d9   : > { %v598_v6 = vpop.eup %597 }
 0x1da   : > { %v339_v7 = vadd.f32 1.0, %v598_v6 }
 0x1dc   : > { %v340_v8 = vmul.f32 %v339_v7, %v337_v5 }
 0x1de   : > { %v406_v9 = vcombine.high %v340_v8, %v340_v8 }
 0x1df   : > { %v600_v11 = vpop.eup %599 }
 0x1e0   : > { %v409_v12 = vcombine.low %v340_v8, %v406_v9  ;;  %v403_v13 = vadd.f32 1.0, %v600_v11 }
 0x1e2   : > { %413 = vst [vmem:[%s267_s11] sm:$0xff] %v409_v12  ;;  %v404_v14 = vmul.f32 %v403_v13, %v401_v10 }
 0x1e4   : > { %v408_v15 = vcombine.high %v404_v14, %v404_v14 }
 0x1e6   : > { %v410_v16 = vcombine.low %v404_v14, %v408_v15 }
 0x1e8   : > { %414 = vst [vmem:[%s267_s11 + $0x8] sm:$0xff] %v410_v16 }
 0x1e9 PF: > { %s13_s14 = sadd.s32 1, %s623_s14   ;;  %s732_s12 = smov %s619_s13 }
 0x1ea   : > { %p10_p5 = scmp.ge.s32.totalorder %s13_s14, 4   ;;  %s733_s13 = smov %s735_s15 }
 0x1ec   :  { %12 = sbr.rel (!%p10_p5) target bundleno = 2 (0x2), region = 68 }

</bundles_post_ra>
